<compile_context>
chip_gen: v7x
topology: tpu7x:2x2x1
jax: 0.10.0
libtpu: 0.0.40
codegen_flags: <defaults>
</compile_context>

<pallas_src>
import functools

import jax
import jax.numpy as jnp
from jax.experimental import pallas as pl
from jax.experimental.pallas import tpu as pltpu


def _round_up(x, m):
    return ((x + m - 1) // m) * m


def _mlp3_kernel(x_ref, w1_ref, b1_ref, w2_ref, b2_ref, w3_ref, b3_ref,
                 o_ref, *, is_skip):
    """Fused 3-layer MLP: relu(x@W1+b1) -> relu(.@W2+b2) -> .@W3+b3 (+x if skip).

    Matmuls run on the MXU in the operands' dtype (f32 or bf16) with f32
    accumulation; bias/ReLU/residual are done in f32 on the VPU.
    """
    x = x_ref[...]

    h1 = jnp.dot(x, w1_ref[...], preferred_element_type=jnp.float32)
    h1 = jnp.maximum(h1 + b1_ref[...], 0.0)
    h1 = h1.astype(w2_ref.dtype)          # back to MXU dtype for next layer

    h2 = jnp.dot(h1, w2_ref[...], preferred_element_type=jnp.float32)
    h2 = jnp.maximum(h2 + b2_ref[...], 0.0)
    h2 = h2.astype(w3_ref.dtype)

    out = jnp.dot(h2, w3_ref[...], preferred_element_type=jnp.float32) + b3_ref[...]

    if is_skip:
        out = out + x.astype(jnp.float32)

    o_ref[...] = out.astype(o_ref.dtype)


def person_encoder_forward(p_queries, params, *, is_skip=False,
                           max_tm=512, mxu_dtype=None,
                           vmem_budget_bytes=32 * 1024 * 1024):
    """p_queries: (..., in_d). Returns same leading shape with last dim out_d.

    mxu_dtype: optional dtype (e.g. jnp.bfloat16) for x and the weights on the
    MXU/DMA path; accumulation, bias add, ReLU and the residual stay in f32.
    """
    w1, b1, w2, b2, w3, b3 = params
    in_d, hid = w1.shape
    out_d = w3.shape[1]
    if is_skip and in_d != out_d:
        raise ValueError("is_skip=True requires in_d == out_d for the residual add")

    orig_shape = p_queries.shape
    orig_dtype = p_queries.dtype
    x2d = p_queries.reshape(-1, in_d)
    n = x2d.shape[0]

    # dtype of MXU operands; biases stay f32.
    op_dtype = mxu_dtype if mxu_dtype is not None else orig_dtype
    x2d = x2d.astype(op_dtype)
    w1c = w1.astype(op_dtype)
    w2c = w2.astype(op_dtype)
    w3c = w3.astype(op_dtype)
    b1r = b1.reshape(1, hid).astype(jnp.float32)
    b2r = b2.reshape(1, hid).astype(jnp.float32)
    b3r = b3.reshape(1, out_d).astype(jnp.float32)

    op_bytes = jnp.dtype(op_dtype).itemsize
    out_bytes = jnp.dtype(orig_dtype).itemsize
    w_total = in_d * hid + hid * hid + hid * out_d
    w_vmem = 2 * w_total * op_bytes + 2 * (2 * hid + out_d) * 4  # double-buffered

    # Row tile: as big as possible (fewer grid steps), multiple of 8, single
    # grid step when the whole input fits; capped so the double-buffered tiles
    # + weights + f32 intermediates fit the VMEM budget (v7x has 64 MiB total).
    tm = min(_round_up(max_tm, 8), _round_up(n, 8))

    def vmem_estimate(t):
        tiles = 2 * t * in_d * op_bytes + 2 * t * out_d * out_bytes
        interm = t * (2 * hid + out_d) * 4  # live f32 h1/h2/out values
        return tiles + interm + w_vmem

    while tm > 8 and vmem_estimate(tm) > vmem_budget_bytes:
        tm = _round_up(tm // 2, 8)

    grid0 = pl.cdiv(n, tm)
    n_pad = grid0 * tm
    if n_pad != n:
        x2d = jnp.pad(x2d, ((0, n_pad - n), (0, 0)))

    kernel = functools.partial(_mlp3_kernel, is_skip=is_skip)

    flops = 2 * n * w_total
    bytes_accessed = (n * in_d * op_bytes + n * out_d * out_bytes
                      + w_total * op_bytes + (2 * hid + out_d) * 4)

    # NOTE: if out_d were < 128 lanes, a lane-dense (N*out_d/128, 128) output
    # view would avoid masked partial stores; with out_d=256 this is already
    # lane-dense.
    out = pl.pallas_call(
        kernel,
        out_shape=jax.ShapeDtypeStruct((n_pad, out_d), orig_dtype),
        grid_spec=pltpu.PrefetchScalarGridSpec(
            num_scalar_prefetch=0,
            grid=(grid0,),
            in_specs=[
                pl.BlockSpec((tm, in_d), lambda i: (i, 0)),     # x row tile
                pl.BlockSpec((in_d, hid), lambda i: (0, 0)),    # W1 (grid-invariant)
                pl.BlockSpec((1, hid), lambda i: (0, 0)),       # b1
                pl.BlockSpec((hid, hid), lambda i: (0, 0)),     # W2
                pl.BlockSpec((1, hid), lambda i: (0, 0)),       # b2
                pl.BlockSpec((hid, out_d), lambda i: (0, 0)),   # W3
                pl.BlockSpec((1, out_d), lambda i: (0, 0)),     # b3
            ],
            out_specs=pl.BlockSpec((tm, out_d), lambda i: (i, 0)),
        ),
        compiler_params=pltpu.CompilerParams(
            dimension_semantics=("parallel",),
            vmem_limit_bytes=64 * 1024 * 1024,
        ),
        cost_estimate=pl.CostEstimate(
            flops=int(flops), transcendentals=0,
            bytes_accessed=int(bytes_accessed)),
    )(x2d, w1c, b1r, w2c, b2r, w3c, b3r)

    if n_pad != n:
        out = out[:n]
    return out.reshape(orig_shape[:-1] + (out_d,))


def init_person_encoder_params(key, in_d, out_d, skip=False):
    """Deterministic parameter init. Weights stored transposed: (in, out)."""
    hid = out_d
    k1, k2, k3 = jax.random.split(key, 3)
    if skip:
        # matches nn.init.normal_(std=0.01), bias=0
        w1 = 0.01 * jax.random.normal(k1, (in_d, hid), jnp.float32)
        w2 = 0.01 * jax.random.normal(k2, (hid, hid), jnp.float32)
        w3 = 0.01 * jax.random.normal(k3, (hid, out_d), jnp.float32)
        b1 = jnp.zeros((hid,), jnp.float32)
        b2 = jnp.zeros((hid,), jnp.float32)
        b3 = jnp.zeros((out_d,), jnp.float32)
    else:
        # emulate default nn.Linear init: U(-1/sqrt(fan_in), 1/sqrt(fan_in))
        def lin(k, fan_in, fan_out):
            kw, kb = jax.random.split(k)
            bound = 1.0 / jnp.sqrt(fan_in)
            w = jax.random.uniform(kw, (fan_in, fan_out), jnp.float32, -bound, bound)
            b = jax.random.uniform(kb, (fan_out,), jnp.float32, -bound, bound)
            return w, b
        w1, b1 = lin(k1, in_d, hid)
        w2, b2 = lin(k2, hid, hid)
        w3, b3 = lin(k3, hid, out_d)
    return (w1, b1, w2, b2, w3, b3)


def person_encoder_ref(p_queries, params, *, is_skip=False):
    """Pure-JAX reference (full-precision f32 matmuls)."""
    w1, b1, w2, b2, w3, b3 = params
    hp = jax.lax.Precision.HIGHEST
    x = p_queries
    h = jax.nn.relu(jnp.dot(x, w1, precision=hp) + b1)
    h = jax.nn.relu(jnp.dot(h, w2, precision=hp) + b2)
    y = jnp.dot(h, w3, precision=hp) + b3
    return y + x if is_skip else y


if __name__ == "__main__":
    # PersonEncoder defaults: in_d = out_d = 256 (lane-dense feature/output dims).
    in_d, out_d = 256, 256
    seq, batch = 8, 2

    key = jax.random.PRNGKey(0)
    kx, kp, ks = jax.random.split(key, 3)

    # --- f32 path, skip=False (single grid step: tm = all 16 rows) ---
    p_queries = jax.random.normal(kx, (seq, batch, in_d), jnp.float32)
    params = init_person_encoder_params(kp, in_d, out_d, skip=False)

    out = person_encoder_forward(p_queries, params, is_skip=False)
    out = jax.block_until_ready(out)
    ref = person_encoder_ref(p_queries, params, is_skip=False)
    assert out.shape == (seq, batch, out_d)
    assert jnp.allclose(out, ref, atol=1e-2, rtol=1e-2), "f32 mismatch vs reference"

    # --- bf16 MXU operands (v6e/v7x fast path), f32 accumulation ---
    out_bf16 = person_encoder_forward(p_queries, params, is_skip=False,
                                      mxu_dtype=jnp.bfloat16)
    out_bf16 = jax.block_until_ready(out_bf16)
    assert out_bf16.dtype == p_queries.dtype
    assert jnp.allclose(out_bf16, ref, atol=1e-1, rtol=1e-1), "bf16 mismatch vs reference"

    # --- skip=True (residual) with the module's skip init; ragged row count
    #     (n=21 -> padded to 24) exercises the cdiv + pad path ---
    pq2 = jax.random.normal(ks, (7, 3, in_d), jnp.float32)
    params_skip = init_person_encoder_params(kp, in_d, out_d, skip=True)
    out_skip = person_encoder_forward(pq2, params_skip, is_skip=True)
    out_skip = jax.block_until_ready(out_skip)
    ref_skip = person_encoder_ref(pq2, params_skip, is_skip=True)
    assert out_skip.shape == (7, 3, out_d)
    assert jnp.allclose(out_skip, ref_skip, atol=1e-2, rtol=1e-2), "skip mismatch"

    print("KERNEL_OK")
</pallas_src>

<mosaic_0001>
module attributes {stable_mosaic.version = 11 : i64} {
  func.func @_mlp3_kernel(%arg0: i32, %arg1: memref<16x256xf32, #tpu.memory_space<vmem>>, %arg2: memref<256x256xf32, #tpu.memory_space<vmem>>, %arg3: memref<1x256xf32, #tpu.memory_space<vmem>>, %arg4: memref<256x256xf32, #tpu.memory_space<vmem>>, %arg5: memref<1x256xf32, #tpu.memory_space<vmem>>, %arg6: memref<256x256xf32, #tpu.memory_space<vmem>>, %arg7: memref<1x256xf32, #tpu.memory_space<vmem>>, %arg8: memref<16x256xf32, #tpu.memory_space<vmem>>) attributes {dimension_semantics = [#tpu.dimension_semantics<parallel>], iteration_bounds = array<i64: 1>, scalar_prefetch = 0 : i64, scratch_operands = 0 : i64, tpu.core_type = #tpu.core_type<tc>, window_params = [{transform_indices = @transform_0, window_bounds = array<i64: 16, 256>}, {pipeline_mode = #tpu.pipeline_mode<synchronous>, transform_indices = @transform_1, window_bounds = array<i64: 256, 256>}, {pipeline_mode = #tpu.pipeline_mode<synchronous>, transform_indices = @transform_2, window_bounds = array<i64: 1, 256>}, {pipeline_mode = #tpu.pipeline_mode<synchronous>, transform_indices = @transform_3, window_bounds = array<i64: 256, 256>}, {pipeline_mode = #tpu.pipeline_mode<synchronous>, transform_indices = @transform_4, window_bounds = array<i64: 1, 256>}, {pipeline_mode = #tpu.pipeline_mode<synchronous>, transform_indices = @transform_5, window_bounds = array<i64: 256, 256>}, {pipeline_mode = #tpu.pipeline_mode<synchronous>, transform_indices = @transform_6, window_bounds = array<i64: 1, 256>}, {transform_indices = @transform_7, window_bounds = array<i64: 16, 256>}]} {
    %c0 = arith.constant 0 : index
    %c0_0 = arith.constant 0 : index
    %0 = vector.load %arg1[%c0, %c0_0] : memref<16x256xf32, #tpu.memory_space<vmem>>, vector<16x256xf32>
    %c0_1 = arith.constant 0 : index
    %c0_2 = arith.constant 0 : index
    %1 = vector.load %arg2[%c0_1, %c0_2] : memref<256x256xf32, #tpu.memory_space<vmem>>, vector<256x256xf32>
    %cst = arith.constant dense<0.000000e+00> : vector<16x256xf32>
    %2 = tpu.matmul %0, %1, %cst {dimension_numbers = #tpu.dot_dimension_numbers<[1], [0], [0], [1], [0, 0, 1, 1], [], []>} : vector<16x256xf32>, vector<256x256xf32>, vector<16x256xf32> -> vector<16x256xf32>
    %c0_3 = arith.constant 0 : index
    %c0_4 = arith.constant 0 : index
    %3 = vector.load %arg3[%c0_3, %c0_4] : memref<1x256xf32, #tpu.memory_space<vmem>>, vector<1x256xf32>
    %4 = vector.broadcast %3 : vector<1x256xf32> to vector<16x256xf32>
    %5 = arith.addf %2, %4 : vector<16x256xf32>
    %cst_5 = arith.constant 0.000000e+00 : f32
    %6 = vector.broadcast %cst_5 : f32 to vector<16x256xf32>
    %7 = arith.maximumf %5, %6 : vector<16x256xf32>
    %c0_6 = arith.constant 0 : index
    %c0_7 = arith.constant 0 : index
    %8 = vector.load %arg4[%c0_6, %c0_7] : memref<256x256xf32, #tpu.memory_space<vmem>>, vector<256x256xf32>
    %cst_8 = arith.constant dense<0.000000e+00> : vector<16x256xf32>
    %9 = tpu.matmul %7, %8, %cst_8 {dimension_numbers = #tpu.dot_dimension_numbers<[1], [0], [0], [1], [0, 0, 1, 1], [], []>} : vector<16x256xf32>, vector<256x256xf32>, vector<16x256xf32> -> vector<16x256xf32>
    %c0_9 = arith.constant 0 : index
    %c0_10 = arith.constant 0 : index
    %10 = vector.load %arg5[%c0_9, %c0_10] : memref<1x256xf32, #tpu.memory_space<vmem>>, vector<1x256xf32>
    %11 = vector.broadcast %10 : vector<1x256xf32> to vector<16x256xf32>
    %12 = arith.addf %9, %11 : vector<16x256xf32>
    %cst_11 = arith.constant 0.000000e+00 : f32
    %13 = vector.broadcast %cst_11 : f32 to vector<16x256xf32>
    %14 = arith.maximumf %12, %13 : vector<16x256xf32>
    %c0_12 = arith.constant 0 : index
    %c0_13 = arith.constant 0 : index
    %15 = vector.load %arg6[%c0_12, %c0_13] : memref<256x256xf32, #tpu.memory_space<vmem>>, vector<256x256xf32>
    %cst_14 = arith.constant dense<0.000000e+00> : vector<16x256xf32>
    %16 = tpu.matmul %14, %15, %cst_14 {dimension_numbers = #tpu.dot_dimension_numbers<[1], [0], [0], [1], [0, 0, 1, 1], [], []>} : vector<16x256xf32>, vector<256x256xf32>, vector<16x256xf32> -> vector<16x256xf32>
    %c0_15 = arith.constant 0 : index
    %c0_16 = arith.constant 0 : index
    %17 = vector.load %arg7[%c0_15, %c0_16] : memref<1x256xf32, #tpu.memory_space<vmem>>, vector<1x256xf32>
    %18 = vector.broadcast %17 : vector<1x256xf32> to vector<16x256xf32>
    %19 = arith.addf %16, %18 : vector<16x256xf32>
    %c0_17 = arith.constant 0 : index
    %c0_18 = arith.constant 0 : index
    %20 = vector.load %arg8[%c0_17, %c0_18] : memref<16x256xf32, #tpu.memory_space<vmem>>, vector<16x256xf32>
    tpu.vector_store %arg8[%c0_17, %c0_18], %19 {strides = array<i32>} : memref<16x256xf32, #tpu.memory_space<vmem>>, vector<16x256xf32>,
    return
  }
  func.func @transform_0(%arg0: i32) -> (i32, i32) {
    %c0_i32 = arith.constant 0 : i32
    %c0_i32_0 = arith.constant 0 : i32
    return %arg0, %c0_i32 : i32, i32
  }
  func.func @transform_1(%arg0: i32) -> (i32, i32) {
    %c0_i32 = arith.constant 0 : i32
    %c0_i32_0 = arith.constant 0 : i32
    %c0_i32_1 = arith.constant 0 : i32
    return %c0_i32, %c0_i32_0 : i32, i32
  }
  func.func @transform_2(%arg0: i32) -> (i32, i32) {
    %c0_i32 = arith.constant 0 : i32
    %c0_i32_0 = arith.constant 0 : i32
    %c0_i32_1 = arith.constant 0 : i32
    return %c0_i32, %c0_i32_0 : i32, i32
  }
  func.func @transform_3(%arg0: i32) -> (i32, i32) {
    %c0_i32 = arith.constant 0 : i32
    %c0_i32_0 = arith.constant 0 : i32
    %c0_i32_1 = arith.constant 0 : i32
    return %c0_i32, %c0_i32_0 : i32, i32
  }
  func.func @transform_4(%arg0: i32) -> (i32, i32) {
    %c0_i32 = arith.constant 0 : i32
    %c0_i32_0 = arith.constant 0 : i32
    %c0_i32_1 = arith.constant 0 : i32
    return %c0_i32, %c0_i32_0 : i32, i32
  }
  func.func @transform_5(%arg0: i32) -> (i32, i32) {
    %c0_i32 = arith.constant 0 : i32
    %c0_i32_0 = arith.constant 0 : i32
    %c0_i32_1 = arith.constant 0 : i32
    return %c0_i32, %c0_i32_0 : i32, i32
  }
  func.func @transform_6(%arg0: i32) -> (i32, i32) {
    %c0_i32 = arith.constant 0 : i32
    %c0_i32_0 = arith.constant 0 : i32
    %c0_i32_1 = arith.constant 0 : i32
    return %c0_i32, %c0_i32_0 : i32, i32
  }
  func.func @transform_7(%arg0: i32) -> (i32, i32) {
    %c0_i32 = arith.constant 0 : i32
    %c0_i32_0 = arith.constant 0 : i32
    return %arg0, %c0_i32 : i32, i32
  }
}

</mosaic_0001>

<bundles_post_ra>
// kernel: tpu_custom_call.1
= control target key start
LH: loop header
LB: loop body
LE: loop exit
PB: predicated region body
PF: predicated region fallthrough
CT: control target
= control target key end

     0   :  { %12 = vsyncpa [#allocation3], 0  ;;  %s1312_s0 = inlined_call_operand.hbm [shape: f32[16,256], index: 0, kind: input, shape index: {}]   ;;  %s1313_s1 = inlined_call_operand.hbm [shape: f32[256,256], index: 1, kind: input, shape index: {}]   ;;  %s1314_s2 = inlined_call_operand.hbm [shape: f32[1,256], index: 2, kind: input, shape index: {}]   ;;  %s1315_s3 = inlined_call_operand.hbm [shape: f32[256,256], index: 3, kind: input, shape index: {}]   ;;  %s1316_s4 = inlined_call_operand.hbm [shape: f32[1,256], index: 4, kind: input, shape index: {}]   ;;  %s1317_s5 = inlined_call_operand.hbm [shape: f32[256,256], index: 5, kind: input, shape index: {}]   ;;  %s1318_s6 = inlined_call_operand.hbm [shape: f32[1,256], index: 6, kind: input, shape index: {}]   ;;  %s1319_s7 = inlined_call_operand.hbm [shape: f32[16,256], index: 7, kind: output, shape index: {}]  }
   0x1   :  { %13 = vsyncpa [#allocation6], 0 }
   0x2   :  { %14 = vsyncpa [#allocation9], 0 }
   0x3   :  { %15 = vsyncpa [#allocation12], 0 }
   0x4   :  { %16 = vsyncpa [#allocation4], 0  ;;  %s1031_s24 = smov [#allocation5]   ;;  %s1032_s26 = smov [#allocation8]  }
   0x5   :  { %s34_s25 = sshll.u32 %s1031_s24, 4  ;;  %s56_s27 = sshll.u32 %s1032_s26, 4  ;;  %s35_s25 = int_to_ptr.vmem [resolvable:$true] %s34_s25  ;;  %s1081_s27 = int_to_ptr.vmem [resolvable:$true] %s56_s27 }
   0x6   :  { %s845_s30 = scalar_lea.hbm %s1313_s1, 8192 }
   0x7   :  { %p846_p0 = scmp.ne.s32.totalorder %s1313_s1, %s845_s30  ;;  %p849_p1 = scmp.lt.u32.totalorder %s845_s30, %s1313_s1 }
   0x9   :  { %p851_p2 = pnand %p849_p1, %p846_p0 }
   0xb   :  { %854 = shalt.err (!%p851_p2)
}
   0xc   :  { %s855_s12 = scalar_lea.vmem %s35_s25, 8192  ;;  %p860_p4 = scmp.lt.s32.totalorder %s35_s25, %s35_s25 }
   0xd   :  { %p856_p3 = scmp.ne.s32.totalorder %s35_s25, %s855_s12  ;;  %p861_p5 = scmp.lt.s32.totalorder %s855_s12, %s855_s12 }
   0xf   :  { %p862_p6 = por %p861_p5, %p860_p4 }
  0x11   :  { %p863_p7 = pnand %p862_p6, %p856_p3 }
  0x13   :  { %866 = shalt.err (!%p863_p7)
}
  0x14   :  { %s1033_s13 = smov 256   ;;  %s1034_s14 = smov 16  }
  0x15   :  { %40 = dma.hbm_to_vmem [thread:$0]  %s1313_s1, 8192, %s35_s25, [#allocation6], %s1033_s13, %s1033_s13, %s1034_s14  }
  0x16   :  { %s867_s19 = scalar_lea.hbm %s1315_s3, 8192 }
  0x17   :  { %p868_p8 = scmp.ne.s32.totalorder %s1315_s3, %s867_s19  ;;  %p871_p9 = scmp.lt.u32.totalorder %s867_s19, %s1315_s3 }
  0x19   :  { %p873_p10 = pnand %p871_p9, %p868_p8 }
  0x1b   :  { %876 = shalt.err (!%p873_p10)
}
  0x1c   :  { %s877_s24 = scalar_lea.vmem %s1081_s27, 8192  ;;  %p882_p12 = scmp.lt.s32.totalorder %s1081_s27, %s1081_s27 }
  0x1d   :  { %p878_p11 = scmp.ne.s32.totalorder %s1081_s27, %s877_s24  ;;  %p883_p13 = scmp.lt.s32.totalorder %s877_s24, %s877_s24 }
  0x1f   :  { %p884_p0 = por %p883_p13, %p882_p12 }
  0x21   :  { %p885_p1 = pnand %p884_p0, %p878_p11 }
  0x23   :  { %888 = shalt.err (!%p885_p1)
}
  0x24   :  { %62 = dma.hbm_to_vmem [thread:$0]  %s1315_s3, 8192, %s1081_s27, [#allocation9], %s1033_s13, %s1033_s13, %s1034_s14  }
  0x25   :  { %s1035_s26 = smov [#allocation11]   ;;  %s1036_s29 = smov [#allocation2]  }
  0x26   :  { %s78_s28 = sshll.u32 %s1035_s26, 4  ;;  %s22_s30 = sshll.u32 %s1036_s29, 4  ;;  %s79_s28 = int_to_ptr.vmem [resolvable:$true] %s78_s28  ;;  %s1118_s30 = int_to_ptr.vmem [resolvable:$true] %s22_s30 }
  0x27   :  { %s889_s10 = scalar_lea.hbm %s1317_s5, 8192 }
  0x28   :  { %p890_p2 = scmp.ne.s32.totalorder %s1317_s5, %s889_s10  ;;  %p893_p3 = scmp.lt.u32.totalorder %s889_s10, %s1317_s5 }
  0x2a   :  { %p895_p4 = pnand %p893_p3, %p890_p2 }
  0x2c   :  { %898 = shalt.err (!%p895_p4)
}
  0x2d   :  { %s899_s3 = scalar_lea.vmem %s79_s28, 8192  ;;  %p904_p6 = scmp.lt.s32.totalorder %s79_s28, %s79_s28 }
  0x2e   :  { %p900_p5 = scmp.ne.s32.totalorder %s79_s28, %s899_s3  ;;  %p905_p7 = scmp.lt.s32.totalorder %s899_s3, %s899_s3 }
  0x30   :  { %p906_p8 = por %p905_p7, %p904_p6 }
  0x32   :  { %p907_p9 = pnand %p906_p8, %p900_p5 }
  0x34   :  { %910 = shalt.err (!%p907_p9)
}
  0x35   :  { %84 = dma.hbm_to_vmem [thread:$0]  %s1317_s5, 8192, %s79_s28, [#allocation12], %s1033_s13, %s1033_s13, %s1034_s14  }
  0x36   :  { %s911_s20 = scalar_lea.hbm %s1312_s0, 512 }
  0x37   :  { %p912_p10 = scmp.ne.s32.totalorder %s1312_s0, %s911_s20  ;;  %p915_p11 = scmp.lt.u32.totalorder %s911_s20, %s1312_s0 }
  0x39   :  { %p917_p12 = pnand %p915_p11, %p912_p10 }
  0x3b   :  { %920 = shalt.err (!%p917_p12)
}
  0x3c   :  { %s921_s1 = scalar_lea.vmem %s1118_s30, 512  ;;  %p926_p0 = scmp.lt.s32.totalorder %s1118_s30, %s1118_s30 }
  0x3d   :  { %p922_p13 = scmp.ne.s32.totalorder %s1118_s30, %s921_s1  ;;  %p927_p1 = scmp.lt.s32.totalorder %s921_s1, %s921_s1 }
  0x3f   :  { %p928_p2 = por %p927_p1, %p926_p0 }
  0x41   :  { %p929_p3 = pnand %p928_p2, %p922_p13 }
  0x43   :  { %932 = shalt.err (!%p929_p3)
}
  0x44   :  { %28 = dma.hbm_to_vmem [thread:$0]  %s1312_s0, 512, %s1118_s30, [#allocation3], %s1033_s13, %s1033_s13, %s1034_s14  }
  0x45   :  { %s1037_s26 = smov [#allocation7]   ;;  %s1038_s29 = smov [#allocation10]  }
  0x46   :  { %s47_s28 = sshll.u32 %s1037_s26, 4  ;;  %s69_s8 = sshll.u32 %s1038_s29, 4  ;;  %s48_s28 = int_to_ptr.vmem [resolvable:$true] %s47_s28  ;;  %s70_s8 = int_to_ptr.vmem [resolvable:$true] %s69_s8 }
  0x47   :  { %s933_s11 = scalar_lea.hbm %s1314_s2, 32 }
  0x48   :  { %p934_p4 = scmp.ne.s32.totalorder %s1314_s2, %s933_s11  ;;  %p937_p5 = scmp.lt.u32.totalorder %s933_s11, %s1314_s2 }
  0x4a   :  { %p939_p6 = pnand %p937_p5, %p934_p4 }
  0x4c   :  { %942 = shalt.err (!%p939_p6)
}
  0x4d   :  { %s943_s0 = scalar_lea.vmem %s48_s28, 32  ;;  %p948_p8 = scmp.lt.s32.totalorder %s48_s28, %s48_s28 }
  0x4e   :  { %p944_p7 = scmp.ne.s32.totalorder %s48_s28, %s943_s0  ;;  %p949_p9 = scmp.lt.s32.totalorder %s943_s0, %s943_s0 }
  0x50   :  { %p950_p10 = por %p949_p9, %p948_p8 }
  0x52   :  { %p951_p11 = pnand %p950_p10, %p944_p7 }
  0x54   :  { %954 = shalt.err (!%p951_p11)
}
  0x55   :  { %50 = dma.hbm_to_vmem [thread:$0]  %s1314_s2, 32, %s48_s28, [#allocation6]  }
  0x56   :  { %s955_s19 = scalar_lea.hbm %s1316_s4, 32 }
  0x57   :  { %p956_p12 = scmp.ne.s32.totalorder %s1316_s4, %s955_s19  ;;  %p959_p13 = scmp.lt.u32.totalorder %s955_s19, %s1316_s4 }
  0x59   :  { %p961_p0 = pnand %p959_p13, %p956_p12 }
  0x5b   :  { %964 = shalt.err (!%p961_p0)
}
  0x5c   :  { %s965_s24 = scalar_lea.vmem %s70_s8, 32  ;;  %p970_p2 = scmp.lt.s32.totalorder %s70_s8, %s70_s8 }
  0x5d   :  { %p966_p1 = scmp.ne.s32.totalorder %s70_s8, %s965_s24  ;;  %p971_p3 = scmp.lt.s32.totalorder %s965_s24, %s965_s24 }
  0x5f   :  { %p972_p4 = por %p971_p3, %p970_p2 }
  0x61   :  { %p973_p5 = pnand %p972_p4, %p966_p1 }
  0x63   :  { %976 = shalt.err (!%p973_p5)
}
  0x64   :  { %72 = dma.hbm_to_vmem [thread:$0]  %s1316_s4, 32, %s70_s8, [#allocation9]  }
  0x65   :  { %s1039_s5 = smov [#allocation13]   ;;  %s977_s29 = scalar_lea.hbm %s1318_s6, 32 }
  0x66   :  { %s91_s25 = sshll.u32 %s1039_s5, 4  ;;  %p978_p6 = scmp.ne.s32.totalorder %s1318_s6, %s977_s29  ;;  %s92_s25 = int_to_ptr.vmem [resolvable:$true] %s91_s25 }
  0x67   :  { %p981_p7 = scmp.lt.u32.totalorder %s977_s29, %s1318_s6 }
  0x69   :  { %p983_p8 = pnand %p981_p7, %p978_p6 }
  0x6b   :  { %986 = shalt.err (!%p983_p8)
}
  0x6c   :  { %s987_s15 = scalar_lea.vmem %s92_s25, 32  ;;  %p992_p10 = scmp.lt.s32.totalorder %s92_s25, %s92_s25 }
  0x6d   :  { %p988_p9 = scmp.ne.s32.totalorder %s92_s25, %s987_s15  ;;  %p993_p11 = scmp.lt.s32.totalorder %s987_s15, %s987_s15 }
  0x6f   :  { %p994_p12 = por %p993_p11, %p992_p10 }
  0x71   :  { %p995_p13 = pnand %p994_p12, %p988_p9 }
  0x73   :  { %998 = shalt.err (!%p995_p13)
}
  0x74   :  { %94 = dma.hbm_to_vmem [thread:$0]  %s1318_s6, 32, %s92_s25, [#allocation12]  }
  0x75   :  { %1021 = dma.done.wait [#allocation3], 512  }
  0x76   :  { %1022 = vsyncadd [#allocation3], 4294966784 }
  0x77   :  { %1023 = dma.done.wait [#allocation6], 8224  }
  0x78   :  { %1024 = vsyncadd [#allocation6], 4294959072 }
  0x79   :  { %1025 = dma.done.wait [#allocation9], 8224  }
  0x7a   :  { %1026 = vsyncadd [#allocation9], 4294959072 }
  0x7b   :  { %1027 = dma.done.wait [#allocation12], 8224  }
  0x7c   :  { %1028 = vsyncadd [#allocation12], 4294959072  ;;  %v121_v0 = vld [vmem:[#allocation5 + $0x8] sm:$0xff]  ;;  %v123_v1 = vld [vmem:[#allocation5 + $0x18] sm:$0xff]  ;;  %s1040_s6 = smov [#allocation14]  }
  0x7d   :  { %v120_v2 = vld [vmem:[#allocation5] sm:$0xff]  ;;  %v611_v3 = vpack.c.bf16 %v123_v1, %v121_v0  ;;  %v122_v4 = vld [vmem:[#allocation5 + $0x10] sm:$0xff]  ;;  %v125_v5 = vld [vmem:[#allocation5 + $0x28] sm:$0xff]  ;;  %s596_s16 = sshll.u32 %s1040_s6, 4  ;;  %s597_s16 = int_to_ptr.vmem [resolvable:$true] %s596_s16 }
  0x7e   :  { %v127_v6 = vld [vmem:[#allocation5 + $0x38] sm:$0xff]  ;;  %v613_v7 = vpack.c.bf16 %v122_v4, %v120_v2  ;;  %v124_v9 = vld [vmem:[#allocation5 + $0x20] sm:$0xff]  ;;  %v126_v10 = vld [vmem:[#allocation5 + $0x30] sm:$0xff]  ;;  %s999_s3 = scalar_lea.vmem %s597_s16, 512  ;;  %p1004_p1 = scmp.lt.s32.totalorder %s597_s16, %s597_s16 }
  0x7f   :  { %v615_v8 = vpack.c.bf16 %v127_v6, %v125_v5  ;;  %v129_v11 = vld [vmem:[#allocation5 + $0x48] sm:$0xff]  ;;  %612 = vmatprep.subr.bf16.mxu0 %v611_v3  ;;  %v131_v12 = vld [vmem:[#allocation5 + $0x58] sm:$0xff]  ;;  %v617_v13 = vpack.c.bf16 %v126_v10, %v124_v9  ;;  %v128_v15 = vld [vmem:[#allocation5 + $0x40] sm:$0xff]  ;;  %p1000_p0 = scmp.ne.s32.totalorder %s597_s16, %s999_s3  ;;  %p1005_p2 = scmp.lt.s32.totalorder %s999_s3, %s999_s3 }
  0x80   :  { %614 = vmatpush1.bf16.msra.mxu0 %v613_v7  ;;  %v619_v14 = vpack.c.bf16 %v131_v12, %v129_v11  ;;  %v130_v16 = vld [vmem:[#allocation5 + $0x50] sm:$0xff]  ;;  %v133_v17 = vld [vmem:[#allocation5 + $0x68] sm:$0xff]  ;;  %v135_v18 = vld [vmem:[#allocation5 + $0x78] sm:$0xff] }
  0x81   :  { %616 = vmatprep.subr.bf16.mxu0 %v615_v8  ;;  %v621_v19 = vpack.c.bf16 %v130_v16, %v128_v15  ;;  %v623_v20 = vpack.c.bf16 %v135_v18, %v133_v17  ;;  %v132_v21 = vld [vmem:[#allocation5 + $0x60] sm:$0xff]  ;;  %v134_v22 = vld [vmem:[#allocation5 + $0x70] sm:$0xff]  ;;  %v137_v23 = vld [vmem:[#allocation5 + $0x88] sm:$0xff]  ;;  %p1006_p3 = por %p1005_p2, %p1004_p1 }
  0x82   :  { %v139_v24 = vld [vmem:[#allocation5 + $0x98] sm:$0xff]  ;;  %v625_v25 = vpack.c.bf16 %v134_v22, %v132_v21  ;;  %v136_v27 = vld [vmem:[#allocation5 + $0x80] sm:$0xff]  ;;  %v138_v28 = vld [vmem:[#allocation5 + $0x90] sm:$0xff] }
  0x83   :  { %v627_v26 = vpack.c.bf16 %v139_v24, %v137_v23  ;;  %v141_v29 = vld [vmem:[#allocation5 + $0xa8] sm:$0xff]  ;;  %v143_v30 = vld [vmem:[#allocation5 + $0xb8] sm:$0xff]  ;;  %v629_v31 = vpack.c.bf16 %v138_v28, %v136_v27  ;;  %v140_v33 = vld [vmem:[#allocation5 + $0xa0] sm:$0xff]  ;;  %p1007_p4 = pnand %p1006_p3, %p1000_p0 }
  0x84   :  { %618 = vmatpush1.bf16.msra.mxu0 %v617_v13  ;;  %v631_v32 = vpack.c.bf16 %v143_v30, %v141_v29  ;;  %v142_v34 = vld [vmem:[#allocation5 + $0xb0] sm:$0xff]  ;;  %v145_v35 = vld [vmem:[#allocation5 + $0xc8] sm:$0xff]  ;;  %v147_v36 = vld [vmem:[#allocation5 + $0xd8] sm:$0xff] }
  0x85   :  { %620 = vmatprep.subr.bf16.mxu0 %v619_v14  ;;  %v633_v37 = vpack.c.bf16 %v142_v34, %v140_v33  ;;  %v635_v38 = vpack.c.bf16 %v147_v36, %v145_v35  ;;  %v144_v39 = vld [vmem:[#allocation5 + $0xc0] sm:$0xff]  ;;  %v146_v40 = vld [vmem:[#allocation5 + $0xd0] sm:$0xff]  ;;  %v117_v41 = vld [vmem:[#allocation2 + $0x8] sm:$0xff] }
  0x86   :  { %v149_v42 = vld [vmem:[#allocation5 + $0xe8] sm:$0xff]  ;;  %v151_v43 = vld [vmem:[#allocation5 + $0xf8] sm:$0xff]  ;;  %260 = vmatprep.mubr.f32.mxu0 %v117_v41  ;;  %v148_v45 = vld [vmem:[#allocation5 + $0xe0] sm:$0xff]  ;;  %v637_v50 = vpack.c.bf16 %v146_v40, %v144_v39 }
  0x87   :  { %v278_v44 = vld [vmem:[#allocation8 + $0x8] sm:$0xff]  ;;  %v280_v47 = vld [vmem:[#allocation8 + $0x18] sm:$0xff]  ;;  %v277_v48 = vld [vmem:[#allocation8] sm:$0xff]  ;;  %v639_v56 = vpack.c.bf16 %v151_v43, %v149_v42 }
  0x88   :  { %622 = vmatpush1.bf16.msra.mxu0 %v621_v19  ;;  %v150_v46 = vld [vmem:[#allocation5 + $0xf0] sm:$0xff]  ;;  %v675_v51 = vpack.c.bf16 %v280_v47, %v278_v44  ;;  %v284_v54 = vld [vmem:[#allocation8 + $0x38] sm:$0xff]  ;;  %v281_v55 = vld [vmem:[#allocation8 + $0x20] sm:$0xff] }
  0x89   :  { %624 = vmatprep.subr.bf16.mxu0 %v623_v20  ;;  %v279_v49 = vld [vmem:[#allocation8 + $0x10] sm:$0xff]  ;;  %v282_v53 = vld [vmem:[#allocation8 + $0x28] sm:$0xff]  ;;  %v288_v60 = vld [vmem:[#allocation8 + $0x58] sm:$0xff]  ;;  %v641_v0 = vpack.c.bf16 %v150_v46, %v148_v45 }
  0x8a   :  { %v677_v52 = vpack.c.bf16 %v279_v49, %v277_v48  ;;  %v679_v57 = vpack.c.bf16 %v284_v54, %v282_v53  ;;  %v283_v58 = vld [vmem:[#allocation8 + $0x30] sm:$0xff]  ;;  %v286_v59 = vld [vmem:[#allocation8 + $0x48] sm:$0xff]  ;;  %676 = vmatprep.subr.bf16.mxu1 %v675_v51  ;;  %v152_v1 = vld [vmem:[#allocation5 + $0x100] sm:$0xff] }
  0x8b   :  { %v153_v61 = vld [vmem:[#allocation5 + $0x108] sm:$0xff]  ;;  %v155_v62 = vld [vmem:[#allocation5 + $0x118] sm:$0xff]  ;;  %v681_v63 = vpack.c.bf16 %v283_v58, %v281_v55  ;;  %v683_v2 = vpack.c.bf16 %v288_v60, %v286_v59  ;;  %v154_v6 = vld [vmem:[#allocation5 + $0x110] sm:$0xff] }
  0x8c   :  { %626 = vmatpush1.bf16.msra.mxu0 %v625_v25  ;;  %678 = vmatpush1.bf16.msra.mxu1 %v677_v52  ;;  %v285_v3 = vld [vmem:[#allocation8 + $0x40] sm:$0xff]  ;;  %v287_v4 = vld [vmem:[#allocation8 + $0x50] sm:$0xff]  ;;  %v643_v5 = vpack.c.bf16 %v155_v62, %v153_v61  ;;  %v290_v7 = vld [vmem:[#allocation8 + $0x68] sm:$0xff]  ;;  %v645_v12 = vpack.c.bf16 %v154_v6, %v152_v1 }
  0x8d   :  { %628 = vmatprep.subr.bf16.mxu0 %v627_v26  ;;  %680 = vmatprep.subr.bf16.mxu1 %v679_v57  ;;  %v292_v8 = vld [vmem:[#allocation8 + $0x78] sm:$0xff]  ;;  %v157_v9 = vld [vmem:[#allocation5 + $0x128] sm:$0xff]  ;;  %v685_v11 = vpack.c.bf16 %v287_v4, %v285_v3  ;;  %v291_v16 = vld [vmem:[#allocation8 + $0x70] sm:$0xff] }
  0x8e   :  { %v159_v10 = vld [vmem:[#allocation5 + $0x138] sm:$0xff]  ;;  %v156_v13 = vld [vmem:[#allocation5 + $0x120] sm:$0xff]  ;;  %v687_v14 = vpack.c.bf16 %v292_v8, %v290_v7  ;;  %v158_v18 = vld [vmem:[#allocation5 + $0x130] sm:$0xff] }
  0x8f   :  { %v289_v15 = vld [vmem:[#allocation8 + $0x60] sm:$0xff]  ;;  %v647_v17 = vpack.c.bf16 %v159_v10, %v157_v9  ;;  %v294_v19 = vld [vmem:[#allocation8 + $0x88] sm:$0xff]  ;;  %v296_v20 = vld [vmem:[#allocation8 + $0x98] sm:$0xff]  ;;  %v649_v24 = vpack.c.bf16 %v158_v18, %v156_v13 }
  0x90   :  { %630 = vmatpush1.bf16.msra.mxu0 %v629_v31  ;;  %682 = vmatpush1.bf16.msra.mxu1 %v681_v63  ;;  %v161_v21 = vld [vmem:[#allocation5 + $0x148] sm:$0xff]  ;;  %v163_v22 = vld [vmem:[#allocation5 + $0x158] sm:$0xff]  ;;  %v689_v23 = vpack.c.bf16 %v291_v16, %v289_v15  ;;  %v160_v25 = vld [vmem:[#allocation5 + $0x140] sm:$0xff]  ;;  %v691_v26 = vpack.c.bf16 %v296_v20, %v294_v19 }
  0x91   :  { %632 = vmatprep.subr.bf16.mxu0 %v631_v32  ;;  %684 = vmatprep.subr.bf16.mxu1 %v683_v2  ;;  %v293_v27 = vld [vmem:[#allocation8 + $0x80] sm:$0xff]  ;;  %v295_v28 = vld [vmem:[#allocation8 + $0x90] sm:$0xff]  ;;  %v651_v29 = vpack.c.bf16 %v163_v22, %v161_v21  ;;  %v298_v31 = vld [vmem:[#allocation8 + $0xa8] sm:$0xff] }
  0x92   :  { %v162_v30 = vld [vmem:[#allocation5 + $0x150] sm:$0xff]  ;;  %v300_v32 = vld [vmem:[#allocation8 + $0xb8] sm:$0xff]  ;;  %v165_v33 = vld [vmem:[#allocation5 + $0x168] sm:$0xff]  ;;  %v693_v35 = vpack.c.bf16 %v295_v28, %v293_v27 }
  0x93   :  { %v167_v34 = vld [vmem:[#allocation5 + $0x178] sm:$0xff]  ;;  %v653_v36 = vpack.c.bf16 %v162_v30, %v160_v25  ;;  %v297_v39 = vld [vmem:[#allocation8 + $0xa0] sm:$0xff]  ;;  %v166_v42 = vld [vmem:[#allocation5 + $0x170] sm:$0xff] }
  0x94   :  { %634 = vmatpush1.bf16.msra.mxu0 %v633_v37  ;;  %686 = vmatpush1.bf16.msra.mxu1 %v685_v11  ;;  %v164_v37 = vld [vmem:[#allocation5 + $0x160] sm:$0xff]  ;;  %v299_v40 = vld [vmem:[#allocation8 + $0xb0] sm:$0xff]  ;;  %v655_v41 = vpack.c.bf16 %v167_v34, %v165_v33  ;;  %v302_v43 = vld [vmem:[#allocation8 + $0xc8] sm:$0xff] }
  0x95   :  { %636 = vmatprep.subr.bf16.mxu0 %v635_v38  ;;  %688 = vmatprep.subr.bf16.mxu1 %v687_v14  ;;  %v695_v38 = vpack.c.bf16 %v300_v32, %v298_v31  ;;  %v304_v44 = vld [vmem:[#allocation8 + $0xd8] sm:$0xff]  ;;  %v169_v45 = vld [vmem:[#allocation5 + $0x188] sm:$0xff]  ;;  %v697_v47 = vpack.c.bf16 %v299_v40, %v297_v39  ;;  %v657_v48 = vpack.c.bf16 %v166_v42, %v164_v37  ;;  %v303_v52 = vld [vmem:[#allocation8 + $0xd0] sm:$0xff] }
  0x96   :  { %v171_v46 = vld [vmem:[#allocation5 + $0x198] sm:$0xff]  ;;  %v168_v49 = vld [vmem:[#allocation5 + $0x180] sm:$0xff]  ;;  %v170_v54 = vld [vmem:[#allocation5 + $0x190] sm:$0xff] }
  0x97   :  { %v301_v51 = vld [vmem:[#allocation8 + $0xc0] sm:$0xff]  ;;  %v659_v53 = vpack.c.bf16 %v171_v46, %v169_v45  ;;  %v306_v55 = vld [vmem:[#allocation8 + $0xe8] sm:$0xff]  ;;  %v175_v58 = vld [vmem:[#allocation5 + $0x1b8] sm:$0xff]  ;;  %v661_v60 = vpack.c.bf16 %v170_v54, %v168_v49 }
  0x98   :  { %638 = vmatpush1.bf16.msra.mxu0 %v637_v50  ;;  %690 = vmatpush1.bf16.msra.mxu1 %v689_v23  ;;  %v699_v50 = vpack.c.bf16 %v304_v44, %v302_v43  ;;  %v173_v57 = vld [vmem:[#allocation5 + $0x1a8] sm:$0xff]  ;;  %v701_v59 = vpack.c.bf16 %v303_v52, %v301_v51  ;;  %v172_v61 = vld [vmem:[#allocation5 + $0x1a0] sm:$0xff]  ;;  %v174_v2 = vld [vmem:[#allocation5 + $0x1b0] sm:$0xff] }
  0x99   :  { %640 = vmatprep.subr.bf16.mxu0 %v639_v56  ;;  %692 = vmatprep.subr.bf16.mxu1 %v691_v26  ;;  %v308_v56 = vld [vmem:[#allocation8 + $0xf8] sm:$0xff]  ;;  %v305_v63 = vld [vmem:[#allocation8 + $0xe0] sm:$0xff]  ;;  %v663_v1 = vpack.c.bf16 %v175_v58, %v173_v57  ;;  %v310_v3 = vld [vmem:[#allocation8 + $0x108] sm:$0xff]  ;;  %v665_v8 = vpack.c.bf16 %v174_v2, %v172_v61 }
  0x9a   :  { %v703_v62 = vpack.c.bf16 %v308_v56, %v306_v55  ;;  %v312_v4 = vld [vmem:[#allocation8 + $0x118] sm:$0xff]  ;;  %v309_v11 = vld [vmem:[#allocation8 + $0x100] sm:$0xff]  ;;  %v178_v14 = vld [vmem:[#allocation5 + $0x1d0] sm:$0xff] }
  0x9b   :  { %v179_v6 = vld [vmem:[#allocation5 + $0x1d8] sm:$0xff]  ;;  %v176_v9 = vld [vmem:[#allocation5 + $0x1c0] sm:$0xff]  ;;  %v707_v10 = vpack.c.bf16 %v312_v4, %v310_v3  ;;  %v314_v15 = vld [vmem:[#allocation8 + $0x128] sm:$0xff] }
  0x9c   :  { %642 = vmatpush1.bf16.msra.mxu0 %v641_v0  ;;  %694 = vmatpush1.bf16.msra.mxu1 %v693_v35  ;;  %v307_v0 = vld [vmem:[#allocation8 + $0xf0] sm:$0xff]  ;;  %v316_v16 = vld [vmem:[#allocation8 + $0x138] sm:$0xff]  ;;  %v669_v20 = vpack.c.bf16 %v178_v14, %v176_v9  ;;  %v313_v23 = vld [vmem:[#allocation8 + $0x120] sm:$0xff] }
  0x9d   :  { %644 = vmatprep.subr.bf16.mxu0 %v643_v5  ;;  %696 = vmatprep.subr.bf16.mxu1 %v695_v38  ;;  %v177_v5 = vld [vmem:[#allocation5 + $0x1c8] sm:$0xff]  ;;  %v705_v7 = vpack.c.bf16 %v307_v0, %v305_v63  ;;  %v183_v18 = vld [vmem:[#allocation5 + $0x1f8] sm:$0xff]  ;;  %v180_v21 = vld [vmem:[#allocation5 + $0x1e0] sm:$0xff]  ;;  %v711_v22 = vpack.c.bf16 %v316_v16, %v314_v15 }
  0x9e   :  { %v667_v13 = vpack.c.bf16 %v179_v6, %v177_v5  ;;  %v182_v26 = vld [vmem:[#allocation5 + $0x1f0] sm:$0xff]  ;;  %v320_v28 = vld [vmem:[#allocation8 + $0x158] sm:$0xff]  ;;  %v317_v32 = vld [vmem:[#allocation8 + $0x140] sm:$0xff] }
  0x9f   :  { %v318_v27 = vld [vmem:[#allocation8 + $0x148] sm:$0xff]  ;;  %v673_v30 = vpack.c.bf16 %v182_v26, %v180_v21  ;;  %v319_v33 = vld [vmem:[#allocation8 + $0x150] sm:$0xff]  ;;  %v324_v35 = vld [vmem:[#allocation8 + $0x178] sm:$0xff] }
  0xa0   :  { %646 = vmatpush1.bf16.msra.mxu0 %v645_v12  ;;  %698 = vmatpush1.bf16.msra.mxu1 %v697_v47  ;;  %v311_v12 = vld [vmem:[#allocation8 + $0x110] sm:$0xff]  ;;  %v715_v31 = vpack.c.bf16 %v320_v28, %v318_v27  ;;  %v322_v34 = vld [vmem:[#allocation8 + $0x168] sm:$0xff]  ;;  %v116_v37 = vld [vmem:[#allocation2] sm:$0xff] }
  0xa1   :  { %648 = vmatprep.subr.bf16.mxu0 %v647_v17  ;;  %700 = vmatprep.subr.bf16.mxu1 %v699_v50  ;;  %v181_v17 = vld [vmem:[#allocation5 + $0x1e8] sm:$0xff]  ;;  %v709_v19 = vpack.c.bf16 %v311_v12, %v309_v11  ;;  %v719_v38 = vpack.c.bf16 %v324_v35, %v322_v34  ;;  %v323_v40 = vld [vmem:[#allocation8 + $0x170] sm:$0xff]  ;;  %v328_v43 = vld [vmem:[#allocation8 + $0x198] sm:$0xff] }
  0xa2   :  { %v671_v25 = vpack.c.bf16 %v183_v18, %v181_v17  ;;  %v321_v39 = vld [vmem:[#allocation8 + $0x160] sm:$0xff]  ;;  %v326_v42 = vld [vmem:[#allocation8 + $0x188] sm:$0xff]  ;;  %v332_v50 = vld [vmem:[#allocation8 + $0x1b8] sm:$0xff] }
  0xa3   :  { %v721_v44 = vpack.c.bf16 %v323_v40, %v321_v39  ;;  %v118_v45 = vld [vmem:[#allocation2 + $0x10] sm:$0xff]  ;;  %v723_v46 = vpack.c.bf16 %v328_v43, %v326_v42  ;;  %v325_v47 = vld [vmem:[#allocation8 + $0x180] sm:$0xff]  ;;  %v336_v56 = vld [vmem:[#allocation8 + $0x1d8] sm:$0xff] }
  0xa4   :  { %650 = vmatpush1.bf16.msra.mxu0 %v649_v24  ;;  %702 = vmatpush1.bf16.msra.mxu1 %v701_v59  ;;  %v315_v24 = vld [vmem:[#allocation8 + $0x130] sm:$0xff]  ;;  %v330_v49 = vld [vmem:[#allocation8 + $0x1a8] sm:$0xff]  ;;  %v333_v59 = vld [vmem:[#allocation8 + $0x1c0] sm:$0xff] }
  0xa5   :  { %652 = vmatprep.subr.bf16.mxu0 %v651_v29  ;;  %704 = vmatprep.subr.bf16.mxu1 %v703_v62  ;;  %v713_v29 = vpack.c.bf16 %v315_v24, %v313_v23  ;;  %v727_v52 = vpack.c.bf16 %v332_v50, %v330_v49  ;;  %v331_v54 = vld [vmem:[#allocation8 + $0x1b0] sm:$0xff]  ;;  %v334_v55 = vld [vmem:[#allocation8 + $0x1c8] sm:$0xff]  ;;  %v340_v63 = vld [vmem:[#allocation8 + $0x1f8] sm:$0xff] }
  0xa6   :  { %v731_v58 = vpack.c.bf16 %v336_v56, %v334_v55  ;;  %v338_v62 = vld [vmem:[#allocation8 + $0x1e8] sm:$0xff]  ;;  %v339_v2 = vld [vmem:[#allocation8 + $0x1f0] sm:$0xff]  ;;  %v437_v5 = vld [vmem:[#allocation11 + $0x18] sm:$0xff] }
  0xa7   :  { %v735_v0 = vpack.c.bf16 %v340_v63, %v338_v62  ;;  %v435_v4 = vld [vmem:[#allocation11 + $0x8] sm:$0xff]  ;;  %v434_v6 = vld [vmem:[#allocation11] sm:$0xff]  ;;  %v440_v14 = vld [vmem:[#allocation11 + $0x30] sm:$0xff] }
  0xa8   :  { %654 = vmatpush1.bf16.msra.mxu0 %v653_v36  ;;  %706 = vmatpush1.bf16.msra.mxu1 %v705_v7  ;;  %v717_v36 = vpack.c.bf16 %v319_v33, %v317_v32  ;;  %v739_v7 = vpack.c.bf16 %v437_v5, %v435_v4  ;;  %v439_v9 = vld [vmem:[#allocation11 + $0x28] sm:$0xff]  ;;  %v445_v16 = vld [vmem:[#allocation11 + $0x58] sm:$0xff]  ;;  %v448_v26 = vld [vmem:[#allocation11 + $0x70] sm:$0xff] }
  0xa9   :  { %656 = vmatprep.subr.bf16.mxu0 %v655_v41  ;;  %708 = vmatprep.subr.bf16.mxu1 %v707_v10  ;;  %v119_v41 = vld [vmem:[#allocation2 + $0x18] sm:$0xff]  ;;  %v443_v15 = vld [vmem:[#allocation11 + $0x48] sm:$0xff]  ;;  %v458_v43 = vld [vmem:[#allocation11 + $0xc0] sm:$0xff] }
  0xaa   :  { %v441_v10 = vld [vmem:[#allocation11 + $0x38] sm:$0xff]  ;;  %v1199_v18 = vpack.c.bf16 %v445_v16, %v443_v15  ;;  %v447_v21 = vld [vmem:[#allocation11 + $0x68] sm:$0xff]  ;;  %v452_v32 = vld [vmem:[#allocation11 + $0x90] sm:$0xff] }
  0xab   :  { %v1193_v12 = vpack.c.bf16 %v441_v10, %v439_v9  ;;  %v451_v27 = vld [vmem:[#allocation11 + $0x88] sm:$0xff]  ;;  %v453_v28 = vld [vmem:[#allocation11 + $0x98] sm:$0xff]  ;;  %v462_v49 = vld [vmem:[#allocation11 + $0xe0] sm:$0xff] }
  0xac   :  { %658 = vmatpush1.bf16.msra.mxu0 %v657_v48  ;;  %710 = vmatpush1.bf16.msra.mxu1 %v709_v19  ;;  %v327_v48 = vld [vmem:[#allocation8 + $0x190] sm:$0xff]  ;;  %v442_v19 = vld [vmem:[#allocation11 + $0x40] sm:$0xff]  ;;  %v457_v34 = vld [vmem:[#allocation11 + $0xb8] sm:$0xff] }
  0xad   :  { %660 = vmatprep.subr.bf16.mxu0 %v659_v53  ;;  %712 = vmatprep.subr.bf16.mxu1 %v711_v22  ;;  %v725_v51 = vpack.c.bf16 %v327_v48, %v325_v47  ;;  %v329_v53 = vld [vmem:[#allocation8 + $0x1a0] sm:$0xff]  ;;  %v455_v33 = vld [vmem:[#allocation11 + $0xa8] sm:$0xff]  ;;  %v464_v50 = vld [vmem:[#allocation11 + $0xf0] sm:$0xff] }
  0xae   :  { %v729_v57 = vpack.c.bf16 %v331_v54, %v329_v53  ;;  %v449_v22 = vld [vmem:[#allocation11 + $0x78] sm:$0xff]  ;;  %v459_v39 = vld [vmem:[#allocation11 + $0xc8] sm:$0xff]  ;;  %v1232_v53 = vpack.c.bf16 %v464_v50, %v462_v49  ;;  %v466_v55 = vld [vmem:[#allocation11 + $0x100] sm:$0xff] }
  0xaf   :  { %v1205_v24 = vpack.c.bf16 %v449_v22, %v447_v21  ;;  %v461_v40 = vld [vmem:[#allocation11 + $0xd8] sm:$0xff]  ;;  %v468_v56 = vld [vmem:[#allocation11 + $0x110] sm:$0xff]  ;;  %v475_v63 = vld [vmem:[#allocation11 + $0x148] sm:$0xff] }
  0xb0   :  { %662 = vmatpush1.bf16.msra.mxu0 %v661_v60  ;;  %714 = vmatpush1.bf16.msra.mxu1 %v713_v29  ;;  %v335_v60 = vld [vmem:[#allocation8 + $0x1d0] sm:$0xff]  ;;  %v1223_v42 = vpack.c.bf16 %v461_v40, %v459_v39  ;;  %v478_v9 = vld [vmem:[#allocation11 + $0x160] sm:$0xff]  ;;  %v489_v22 = vld [vmem:[#allocation11 + $0x1b8] sm:$0xff] }
  0xb1   :  { %664 = vmatprep.subr.bf16.mxu0 %v663_v1  ;;  %716 = vmatprep.subr.bf16.mxu1 %v715_v31  ;;  %v733_v61 = vpack.c.bf16 %v335_v60, %v333_v59  ;;  %v337_v1 = vld [vmem:[#allocation8 + $0x1e0] sm:$0xff]  ;;  %v1238_v59 = vpack.c.bf16 %v468_v56, %v466_v55  ;;  %v472_v62 = vld [vmem:[#allocation11 + $0x130] sm:$0xff]  ;;  %v479_v5 = vld [vmem:[#allocation11 + $0x168] sm:$0xff] }
  0xb2   :  { %v737_v3 = vpack.c.bf16 %v339_v2, %v337_v1  ;;  %v450_v31 = vld [vmem:[#allocation11 + $0x80] sm:$0xff]  ;;  %v476_v4 = vld [vmem:[#allocation11 + $0x150] sm:$0xff]  ;;  %v487_v21 = vld [vmem:[#allocation11 + $0x1a8] sm:$0xff] }
  0xb3   :  { %v1214_v35 = vpack.c.bf16 %v452_v32, %v450_v31  ;;  %v480_v10 = vld [vmem:[#allocation11 + $0x170] sm:$0xff]  ;;  %v491_v31 = vld [vmem:[#allocation11 + $0x1c8] sm:$0xff]  ;;  %v493_v32 = vld [vmem:[#allocation11 + $0x1d8] sm:$0xff] }
  0xb4   :  { %666 = vmatpush1.bf16.msra.mxu0 %v665_v8  ;;  %718 = vmatpush1.bf16.msra.mxu1 %v717_v36  ;;  %v436_v8 = vld [vmem:[#allocation11 + $0x10] sm:$0xff]  ;;  %v1217_v36 = vpack.c.bf16 %v457_v34, %v455_v33  ;;  %v1256_v15 = vpack.c.bf16 %v480_v10, %v478_v9  ;;  %v795_v34 = vpack.c.bf16 %v493_v32, %v491_v31  ;;  %v184_v40 = vld [vmem:[#allocation7] sm:$0x3] }
  0xb5   :  { %668 = vmatprep.subr.bf16.mxu0 %v667_v13  ;;  %720 = vmatprep.subr.bf16.mxu1 %v719_v38  ;;  %v1191_v11 = vpack.c.bf16 %v436_v8, %v434_v6  ;;  %v438_v13 = vld [vmem:[#allocation11 + $0x20] sm:$0xff]  ;;  %v456_v38 = vld [vmem:[#allocation11 + $0xb0] sm:$0xff]  ;;  %v481_v6 = vld [vmem:[#allocation11 + $0x178] sm:$0xff] }
  0xb6   :  { %v1196_v17 = vpack.c.bf16 %v440_v14, %v438_v13  ;;  %v1253_v8 = vpack.c.bf16 %v481_v6, %v479_v5  ;;  %v483_v13 = vld [vmem:[#allocation11 + $0x188] sm:$0xff]  ;;  %v485_v14 = vld [vmem:[#allocation11 + $0x198] sm:$0xff]  ;;  %v498_v6 = vld [vmem:[#allocation13] sm:$0x3] }
  0xb7   :  { %v1259_v16 = vpack.c.bf16 %v485_v14, %v483_v13 }
  0xb8   :  { %670 = vmatpush1.bf16.msra.mxu0 %v669_v20  ;;  %722 = vmatpush1.bf16.msra.mxu1 %v721_v44  ;;  %v444_v20 = vld [vmem:[#allocation11 + $0x50] sm:$0xff] }
  0xb9   :  { %672 = vmatprep.subr.bf16.mxu0 %v671_v25  ;;  %724 = vmatprep.subr.bf16.mxu1 %v723_v46  ;;  %v1202_v23 = vpack.c.bf16 %v444_v20, %v442_v19  ;;  %v446_v25 = vld [vmem:[#allocation11 + $0x60] sm:$0xff]  ;;  %v460_v44 = vld [vmem:[#allocation11 + $0xd0] sm:$0xff]  ;;  %v465_v46 = vld [vmem:[#allocation11 + $0xf8] sm:$0xff] }
  0xba   :  { %v1208_v29 = vpack.c.bf16 %v448_v26, %v446_v25  ;;  %v1226_v47 = vpack.c.bf16 %v460_v44, %v458_v43  ;;  %v482_v19 = vld [vmem:[#allocation11 + $0x180] sm:$0xff]  ;;  %v484_v20 = vld [vmem:[#allocation11 + $0x190] sm:$0xff]  ;;  %v791_v26 = vpack.c.bf16 %v489_v22, %v487_v21 }
  0xbb   :  { %v789_v25 = vpack.c.bf16 %v484_v20, %v482_v19 }
  0xbc   :  { %674 = vmatpush1.bf16.msra.mxu0 %v673_v30  ;;  %726 = vmatpush1.bf16.msra.mxu1 %v725_v51  ;;  %v1211_v30 = vpack.c.bf16 %v453_v28, %v451_v27  ;;  %v467_v51 = vld [vmem:[#allocation11 + $0x108] sm:$0xff]  ;;  %v486_v27 = vld [vmem:[#allocation11 + $0x1a0] sm:$0xff]  ;;  %v488_v28 = vld [vmem:[#allocation11 + $0x1b0] sm:$0xff] }
  0xbd   :  { %728 = vmatprep.subr.bf16.mxu1 %v727_v52  ;;  %740 = vmatprep.subr.bf16.mxu0 %v739_v7  ;;  %v469_v52 = vld [vmem:[#allocation11 + $0x118] sm:$0xff]  ;;  %v793_v33 = vpack.c.bf16 %v488_v28, %v486_v27 }
  0xbe   :  { %v1235_v54 = vpack.c.bf16 %v469_v52, %v467_v51 }
  0xbf   :  { %261 = vmatmul.mubr.f32.vlgmr.msra.gmra.mrb[0].mxu0 %v116_v37  ;;  %v454_v37 = vld [vmem:[#allocation11 + $0xa0] sm:$0xff] }
  0xc0   :  { %266 = vmatprep.mubr.f32.mxu0 %v119_v41  ;;  %730 = vmatpush1.bf16.msra.mxu1 %v729_v57  ;;  %v1220_v41 = vpack.c.bf16 %v456_v38, %v454_v37  ;;  %v471_v57 = vld [vmem:[#allocation11 + $0x128] sm:$0xff]  ;;  %v186_v37 = vlaneseq }
  0xc1   :  { %732 = vmatprep.subr.bf16.mxu1 %v731_v58  ;;  %742 = vmatpush1.bf16.msra.mxu0 %v1191_v11  ;;  %v473_v58 = vld [vmem:[#allocation11 + $0x138] sm:$0xff] }
  0xc2   :  { %744 = vmatprep.subr.bf16.mxu0 %v1193_v12  ;;  %v1241_v60 = vpack.c.bf16 %v473_v58, %v471_v57  ;;  %v187_v38 = vshrl.u32 %v186_v37, 7 }
  0xc3   :  { %267 = vmatmul.mubr.f32.gmra.mrb[2].mxu0 %v118_v45  ;;  %v463_v45 = vld [vmem:[#allocation11 + $0xe8] sm:$0xff] }
  0xc4   :  { %734 = vmatpush1.bf16.msra.mxu1 %v733_v61  ;;  %v1229_v48 = vpack.c.bf16 %v465_v46, %v463_v45  ;;  %v470_v61 = vld [vmem:[#allocation11 + $0x120] sm:$0xff]  ;;  %v1263_v39 = vsub.s32 0, %v187_v38  ;;  %v1265_v43 = vsub.s32 1, %v187_v38 }
  0xc5   :  { %736 = vmatprep.subr.bf16.mxu1 %v735_v0  ;;  %746 = vmatpush1.bf16.msra.mxu0 %v1196_v17  ;;  %v477_v0 = vld [vmem:[#allocation11 + $0x158] sm:$0xff]  ;;  %v1244_v1 = vpack.c.bf16 %v472_v62, %v470_v61 }
  0xc6   :  { %748 = vmatprep.subr.bf16.mxu0 %v1199_v18  ;;  %v1247_v2 = vpack.c.bf16 %v477_v0, %v475_v63  ;;  %v189_v44 = vrot.slane %v184_v40, %v1263_v39  ;;  %v193_v45 = vrot.slane %v184_v40, %v1265_v43 }
  0xc8   :  { %738 = vmatpush1.bf16.msra.mxu1 %v737_v3  ;;  %v474_v3 = vld [vmem:[#allocation11 + $0x140] sm:$0xff] }
  0xc9   :  { %803 = vmatprep.subr.bf16.mxu1 %v739_v7  ;;  %750 = vmatpush1.bf16.msra.mxu0 %v1202_v23  ;;  %v1250_v7 = vpack.c.bf16 %v476_v4, %v474_v3 }
  0xca   :  { %752 = vmatprep.subr.bf16.mxu0 %v1205_v24 }
  0xcd   :  { %754 = vmatpush1.bf16.msra.mxu0 %v1208_v29 }
  0xce   :  { %756 = vmatprep.subr.bf16.mxu0 %v1211_v30 }
  0xd1   :  { %758 = vmatpush1.bf16.msra.mxu0 %v1214_v35 }
  0xd2   :  { %760 = vmatprep.subr.bf16.mxu0 %v1217_v36 }
  0xd5   :  { %762 = vmatpush1.bf16.msra.mxu0 %v1220_v41 }
  0xd6   :  { %764 = vmatprep.subr.bf16.mxu0 %v1223_v42 }
  0xd9   :  { %766 = vmatpush1.bf16.msra.mxu0 %v1226_v47 }
  0xda   :  { %768 = vmatprep.subr.bf16.mxu0 %v1229_v48 }
  0xdd   :  { %770 = vmatpush1.bf16.msra.mxu0 %v1232_v53 }
  0xde   :  { %772 = vmatprep.subr.bf16.mxu0 %v1235_v54 }
  0xe1   :  { %774 = vmatpush1.bf16.msra.mxu0 %v1238_v59 }
  0xe2   :  { %776 = vmatprep.subr.bf16.mxu0 %v1241_v60 }
  0xe5   :  { %778 = vmatpush1.bf16.msra.mxu0 %v1244_v1 }
  0xe6   :  { %780 = vmatprep.subr.bf16.mxu0 %v1247_v2 }
  0xe9   :  { %782 = vmatpush1.bf16.msra.mxu0 %v1250_v7 }
  0xea   :  { %784 = vmatprep.subr.bf16.mxu0 %v1253_v8 }
  0xed   :  { %786 = vmatpush1.bf16.msra.mxu0 %v1256_v15 }
  0xee   :  { %788 = vmatprep.subr.bf16.mxu0 %v1259_v16 }
  0xf1   :  { %790 = vmatpush1.bf16.msra.mxu0 %v789_v25 }
  0xf2   :  { %792 = vmatprep.subr.bf16.mxu0 %v791_v26 }
  0xf5   :  { %794 = vmatpush1.bf16.msra.mxu0 %v793_v33 }
  0xf6   :  { %796 = vmatprep.subr.bf16.mxu0 %v795_v34 }
 0x192   :  { %v262_v46 = vpop.f32.mrb[0].mxu0 }
 0x193   :  { %v263_v49 = vadd.f32 %v262_v46, %v189_v44  ;;  %v264_v50 = vpop.f32.mrb[1].mxu0 }
 0x194   :  { %v265_v51 = vadd.f32 %v264_v50, %v193_v45 }
 0x195   :  { %v273_v56 = vmax.f32 %v263_v49, 0.0 }
 0x196   :  { %v268_v52 = vpop.f32.mrb[2].mxu0  ;;  %v274_v55 = vmax.f32 %v265_v51, 0.0 }
 0x197   :  { %v269_v57 = vadd.f32 %v268_v52, %v189_v44  ;;  %v270_v58 = vpop.f32.mrb[3].mxu0 }
 0x198   :  { %v271_v61 = vadd.f32 %v270_v58, %v193_v45  ;;  %417 = vmatprep.mubr.f32.mxu1 %v274_v55 }
 0x199   :  { %418 = vmatmul.mubr.f32.vlgmr.msra.gmra.mrb[0].mxu1 %v273_v56  ;;  %v275_v63 = vmax.f32 %v269_v57, 0.0 }
 0x19a   :  { %v276_v62 = vmax.f32 %v271_v61, 0.0  ;;  %819 = vmatpush1.bf16.msra.mxu1 %v1191_v11  ;;  %v490_v11 = vld [vmem:[#allocation11 + $0x1c0] sm:$0xff] }
 0x19b   :  { %804 = vmatprep.subr.bf16.mxu1 %v1193_v12  ;;  %v492_v12 = vld [vmem:[#allocation11 + $0x1d0] sm:$0xff] }
 0x19c   :  { %423 = vmatprep.mubr.f32.mxu1 %v276_v62 }
 0x19d   :  { %424 = vmatmul.mubr.f32.gmra.mrb[2].mxu1 %v275_v63 }
 0x19e   :  { %820 = vmatpush1.bf16.msra.mxu1 %v1196_v17  ;;  %v797_v17 = vpack.c.bf16 %v492_v12, %v490_v11 }
 0x19f   :  { %805 = vmatprep.subr.bf16.mxu1 %v1199_v18  ;;  %v495_v18 = vld [vmem:[#allocation11 + $0x1e8] sm:$0xff] }
 0x1a0   :  { %798 = vmatpush1.bf16.msra.mxu0 %v797_v17 }
 0x1a2   :  { %821 = vmatpush1.bf16.msra.mxu1 %v1202_v23  ;;  %v497_v23 = vld [vmem:[#allocation11 + $0x1f8] sm:$0xff] }
 0x1a3   :  { %806 = vmatprep.subr.bf16.mxu1 %v1205_v24  ;;  %v799_v24 = vpack.c.bf16 %v497_v23, %v495_v18 }
 0x1a5   :  { %800 = vmatprep.subr.bf16.mxu0 %v799_v24 }
 0x1a6   :  { %822 = vmatpush1.bf16.msra.mxu1 %v1208_v29  ;;  %v494_v29 = vld [vmem:[#allocation11 + $0x1e0] sm:$0xff] }
 0x1a7   :  { %807 = vmatprep.subr.bf16.mxu1 %v1211_v30  ;;  %v496_v30 = vld [vmem:[#allocation11 + $0x1f0] sm:$0xff] }
 0x1aa   :  { %823 = vmatpush1.bf16.msra.mxu1 %v1214_v35  ;;  %v801_v35 = vpack.c.bf16 %v496_v30, %v494_v29 }
 0x1ab   :  { %808 = vmatprep.subr.bf16.mxu1 %v1217_v36  ;;  %v341_v36 = vld [vmem:[#allocation10] sm:$0x3] }
 0x1ac   :  { %802 = vmatpush1.bf16.msra.mxu0 %v801_v35 }
 0x1ae   :  { %824 = vmatpush1.bf16.msra.mxu1 %v1220_v41  ;;  %v346_v41 = vrot.slane %v341_v36, %v1263_v39 }
 0x1af   :  { %809 = vmatprep.subr.bf16.mxu1 %v1223_v42  ;;  %v350_v42 = vrot.slane %v341_v36, %v1265_v43 }
 0x1b2   :  { %825 = vmatpush1.bf16.msra.mxu1 %v1226_v47 }
 0x1b3   :  { %810 = vmatprep.subr.bf16.mxu1 %v1229_v48 }
 0x1b6   :  { %826 = vmatpush1.bf16.msra.mxu1 %v1232_v53 }
 0x1b7   :  { %811 = vmatprep.subr.bf16.mxu1 %v1235_v54 }
 0x1ba   :  { %827 = vmatpush1.bf16.msra.mxu1 %v1238_v59 }
 0x1bb   :  { %812 = vmatprep.subr.bf16.mxu1 %v1241_v60 }
 0x1be   :  { %828 = vmatpush1.bf16.msra.mxu1 %v1244_v1 }
 0x1bf   :  { %813 = vmatprep.subr.bf16.mxu1 %v1247_v2 }
 0x1c2   :  { %829 = vmatpush1.bf16.msra.mxu1 %v1250_v7  ;;  %v503_v7 = vrot.slane %v498_v6, %v1263_v39 }
 0x1c3   :  { %814 = vmatprep.subr.bf16.mxu1 %v1253_v8  ;;  %v507_v8 = vrot.slane %v498_v6, %v1265_v43 }
 0x1c6   :  { %830 = vmatpush1.bf16.msra.mxu1 %v1256_v15 }
 0x1c7   :  { %815 = vmatprep.subr.bf16.mxu1 %v1259_v16 }
 0x1ca   :  { %831 = vmatpush1.bf16.msra.mxu1 %v789_v25 }
 0x1cb   :  { %816 = vmatprep.subr.bf16.mxu1 %v791_v26 }
 0x1ce   :  { %832 = vmatpush1.bf16.msra.mxu1 %v793_v33 }
 0x1cf   :  { %817 = vmatprep.subr.bf16.mxu1 %v795_v34 }
 0x1d2   :  { %833 = vmatpush1.bf16.msra.mxu1 %v797_v17 }
 0x1d3   :  { %818 = vmatprep.subr.bf16.mxu1 %v799_v24 }
 0x1d6   :  { %834 = vmatpush1.bf16.msra.mxu1 %v801_v35 }
 0x26c   :  { %v419_v47 = vpop.f32.mrb[0].mxu1 }
 0x26d   :  { %v420_v48 = vadd.f32 %v419_v47, %v346_v41  ;;  %v421_v53 = vpop.f32.mrb[1].mxu1 }
 0x26e   :  { %v422_v54 = vadd.f32 %v421_v53, %v350_v42 }
 0x26f   :  { %v430_v0 = vmax.f32 %v420_v48, 0.0 }
 0x270   :  { %v431_v59 = vmax.f32 %v422_v54, 0.0  ;;  %v425_v60 = vpop.f32.mrb[2].mxu1 }
 0x271   :  { %v426_v1 = vadd.f32 %v425_v60, %v346_v41  ;;  %v427_v2 = vpop.f32.mrb[3].mxu1 }
 0x272   :  { %v428_v3 = vadd.f32 %v427_v2, %v350_v42  ;;  %574 = vmatprep.mubr.f32.mxu0 %v431_v59 }
 0x273   :  { %575 = vmatmul.mubr.f32.vlgmr.msra.gmra.mrb[4].mxu0 %v430_v0  ;;  %v432_v5 = vmax.f32 %v426_v1, 0.0 }
 0x274   :  { %v433_v4 = vmax.f32 %v428_v3, 0.0 }
 0x276   :  { %580 = vmatprep.mubr.f32.mxu1 %v433_v4 }
 0x277   :  { %581 = vmatmul.mubr.f32.vlgmr.msra.gmra.mrb[4].mxu1 %v432_v5 }
 0x346   :  { %v576_v9 = vpop.f32.mrb[4].mxu0 }
 0x347   :  { %v577_v10 = vadd.f32 %v576_v9, %v503_v7  ;;  %v578_v13 = vpop.f32.mrb[5].mxu0 }
 0x348   :  { %v579_v14 = vadd.f32 %v578_v13, %v507_v8 }
 0x349   :  { %587 = vst [vmem:[#allocation14] sm:$0xff] %v577_v10 }
 0x34a   :  { %588 = vst [vmem:[#allocation14 + $0x8] sm:$0xff] %v579_v14  ;;  %v582_v15 = vpop.f32.mrb[4].mxu1 }
 0x34b   :  { %v583_v16 = vadd.f32 %v582_v15, %v503_v7  ;;  %v584_v19 = vpop.f32.mrb[5].mxu1 }
 0x34c   :  { %v585_v20 = vadd.f32 %v584_v19, %v507_v8 }
 0x34d   :  { %589 = vst [vmem:[#allocation14 + $0x10] sm:$0xff] %v583_v16 }
 0x34e   :  { %590 = vst [vmem:[#allocation14 + $0x18] sm:$0xff] %v585_v20 }
 0x34f   :  { %1010 = shalt.err (!%p1007_p4)
}
 0x350   :  { %s1011_s27 = scalar_lea.hbm %s1319_s7, 512 }
 0x351   :  { %p1012_p5 = scmp.ne.s32.totalorder %s1319_s7, %s1011_s27  ;;  %p1015_p6 = scmp.lt.u32.totalorder %s1011_s27, %s1319_s7 }
 0x353   :  { %p1017_p7 = pnand %p1015_p6, %p1012_p5 }
 0x355   :  { %1020 = shalt.err (!%p1017_p7)
}
 0x356   :  { %602 = dma.vmem_to_hbm [thread:$0]  %s597_s16, 512, %s1319_s7, [#allocation4], %s1033_s13, %s1033_s13, %s1034_s14  }
 0x357   :  { %1029 = dma.done.wait [#allocation4], 512  }
 0x358   :  { %1030 = vsyncadd [#allocation4], 4294966784 }
 0x359   :  { %606 = vsyncpa [#allocation3], 1 }
 0x35a   :  { %607 = vsyncpa [#allocation6], 1 }
 0x35b   :  { %608 = vsyncpa [#allocation9], 1 }
 0x35c   :  { %609 = vsyncpa [#allocation12], 1 }
 0x35d   :  { %610 = vsyncpa [#allocation4], 1 }

</bundles_post_ra>
